<compile_context>
chip_gen: v6e
topology: v6e:2x2x1
jax: 0.10.0
libtpu: 0.0.40
codegen_flags: <defaults>
</compile_context>

<pallas_src>
import jax
import jax.numpy as jnp
from jax.experimental import pallas as pl
from jax.experimental.pallas import tpu as pltpu


NEG_INF = jnp.float32(-1e30)  # padded-class bias -> exp() underflows to 0


def _classifier_kernel(x_ref, w1_ref, b1_ref, w2_ref, b2_ref,
                       w3_ref, b3_ref, w4_ref, b4_ref, out_ref):
    # In-kernel f32 -> bf16 cast of the activations (hides under the x DMA).
    x = x_ref[...].astype(jnp.bfloat16)
    # fc1 + ReLU  (bf16 x bf16 -> f32 acc on MXU; bias/ReLU in f32 on VPU)
    h = jnp.dot(x, w1_ref[...], preferred_element_type=jnp.float32)
    h = jnp.maximum(h + b1_ref[...], 0.0)
    # fc2 + ReLU
    h = jnp.dot(h.astype(jnp.bfloat16), w2_ref[...],
                preferred_element_type=jnp.float32)
    h = jnp.maximum(h + b2_ref[...], 0.0)
    # fc3 + ReLU
    h = jnp.dot(h.astype(jnp.bfloat16), w3_ref[...],
                preferred_element_type=jnp.float32)
    h = jnp.maximum(h + b3_ref[...], 0.0)
    # fc4 -> lane-dense (tile, 128) logits; padded columns carry a -1e30 bias
    # so they contribute exactly 0 to the softmax denominator.
    logits = jnp.dot(h.astype(jnp.bfloat16), w4_ref[...],
                     preferred_element_type=jnp.float32)
    logits = logits + b4_ref[...]
    # log_softmax over the class axis (numerically stable, f32)
    m = jnp.max(logits, axis=-1, keepdims=True)
    lse = m + jnp.log(jnp.sum(jnp.exp(logits - m), axis=-1, keepdims=True))
    out_ref[...] = (logits - lse).astype(out_ref.dtype)  # bf16 writeback


def _round_up(x, m):
    return ((x + m - 1) // m) * m


def _select_tile(batch, tile_b):
    """Batch-tile rows: multiple of 16 (bf16-out sublane packing), capped at
    tile_b, and chosen so the grid has >= 2 steps when batch >= 32 so the
    'parallel' axis can shard across v7x's two TensorCores."""
    if batch <= 16:
        return batch  # single full-batch block (block == full dim is allowed)
    tile = min(tile_b, _round_up(batch, 16))
    tile = min(tile, _round_up(pl.cdiv(batch, 2), 16))
    return max(tile, 16)


def classifier_forward(x_nchw, params, tile_b=1024):
    """x_nchw: (B, 1, 28, 28) float32; returns (B, 10) float32 log-probs."""
    B = x_nchw.shape[0]
    x = x_nchw.reshape(B, -1)  # == torch x.view(B, -1); stays f32, cast in-kernel
    w1, b1, w2, b2, w3, b3, w4, b4 = params

    # Pad fc4 to 128 output lanes: zero weight columns, -1e30 bias columns.
    w4p = jnp.zeros((64, 128), jnp.bfloat16).at[:, :10].set(w4)
    b4p = jnp.full((1, 128), NEG_INF, jnp.float32).at[:, :10].set(b4)

    tile = _select_tile(B, tile_b)
    grid = (pl.cdiv(B, tile),)  # last block may be partial; OOB rows dropped

    def resident(shape):  # weights/biases: same block every step -> stay in VMEM
        return pl.BlockSpec(shape, lambda i: (0, 0))

    # VMEM working-set estimate: double-buffered f32 x tile + double-buffered
    # bf16 out tile + ~0.5 MB resident weights.  Only emit a vmem_limit hint
    # if a caller raises tile_b past the per-generation scoped defaults.
    est_bytes = 2 * tile * 784 * 4 + 2 * tile * 128 * 2 + (1 << 20)
    cp_kwargs = dict(dimension_semantics=("parallel",))
    if est_bytes > (12 << 20):
        cp_kwargs["vmem_limit_bytes"] = min(est_bytes + (4 << 20), 48 << 20)

    out = pl.pallas_call(
        _classifier_kernel,
        out_shape=jax.ShapeDtypeStruct((B, 128), jnp.bfloat16),
        grid=grid,
        in_specs=[
            pl.BlockSpec((tile, 784), lambda i: (i, 0)),   # x tiles, pipelined
            resident((784, 256)), resident((1, 256)),      # fc1
            resident((256, 128)), resident((1, 128)),      # fc2
            resident((128, 64)),  resident((1, 64)),       # fc3
            resident((64, 128)),  resident((1, 128)),      # fc4 (lane padded)
        ],
        out_specs=pl.BlockSpec((tile, 128), lambda i: (i, 0)),
        compiler_params=pltpu.CompilerParams(**cp_kwargs),
    )(x, w1, b1, w2, b2, w3, b3, w4p, b4p)
    # Single small slice+cast pass (256 B/row read -> 40 B/row write).
    return out[:, :10].astype(jnp.float32)


def init_params(key):
    """torch.nn.Linear-style init: U(-1/sqrt(fan_in), 1/sqrt(fan_in)).
    Weights stored transposed (in, out) and cast to bf16; biases kept f32."""
    dims = [(784, 256), (256, 128), (128, 64), (64, 10)]
    params = []
    keys = jax.random.split(key, 2 * len(dims))
    for i, (fan_in, fan_out) in enumerate(dims):
        bound = 1.0 / (fan_in ** 0.5)
        w = jax.random.uniform(keys[2 * i], (fan_in, fan_out),
                               minval=-bound, maxval=bound,
                               dtype=jnp.float32).astype(jnp.bfloat16)
        b = jax.random.uniform(keys[2 * i + 1], (1, fan_out),
                               minval=-bound, maxval=bound, dtype=jnp.float32)
        params.extend([w, b])
    return tuple(params)


def _reference_forward(x_nchw, params):
    # Pure-JAX reference with the same bf16-in / f32-accumulate numerics.
    w1, b1, w2, b2, w3, b3, w4, b4 = params
    x = x_nchw.reshape(x_nchw.shape[0], -1).astype(jnp.bfloat16)
    h = jnp.maximum(jnp.dot(x, w1, preferred_element_type=jnp.float32) + b1, 0.0)
    h = jnp.maximum(jnp.dot(h.astype(jnp.bfloat16), w2,
                            preferred_element_type=jnp.float32) + b2, 0.0)
    h = jnp.maximum(jnp.dot(h.astype(jnp.bfloat16), w3,
                            preferred_element_type=jnp.float32) + b3, 0.0)
    logits = jnp.dot(h.astype(jnp.bfloat16), w4,
                     preferred_element_type=jnp.float32) + b4
    return jax.nn.log_softmax(logits, axis=-1)


if __name__ == "__main__":
    key = jax.random.PRNGKey(0)
    k_param, k_x = jax.random.split(key)

    params = init_params(k_param)
    # FashionMNIST-like input, normalized to roughly [-1, 1]; batch=64 as in
    # the original DataLoader (exercises the 2-step grid used for v7x).
    x = jax.random.uniform(k_x, (64, 1, 28, 28), minval=-1.0, maxval=1.0,
                           dtype=jnp.float32)

    log_ps = jax.block_until_ready(classifier_forward(x, params))
    ref = _reference_forward(x, params)

    assert log_ps.shape == (64, 10)
    # Tolerance accounts for the bf16 log-prob writeback (rel err ~2^-8).
    assert jnp.allclose(log_ps, ref, atol=3e-2, rtol=3e-2)
    # log-probs should sum (in prob space) to ~1 per row.
    assert jnp.allclose(jnp.sum(jnp.exp(log_ps), axis=1), 1.0, atol=2e-2)

    print("KERNEL_OK")
</pallas_src>

<mosaic_0001>
module attributes {stable_mosaic.version = 11 : i64} {
  func.func @_classifier_kernel(%arg0: i32, %arg1: memref<32x784xf32, #tpu.memory_space<vmem>>, %arg2: memref<784x256xbf16, #tpu.memory_space<vmem>>, %arg3: memref<1x256xf32, #tpu.memory_space<vmem>>, %arg4: memref<256x128xbf16, #tpu.memory_space<vmem>>, %arg5: memref<1x128xf32, #tpu.memory_space<vmem>>, %arg6: memref<128x64xbf16, #tpu.memory_space<vmem>>, %arg7: memref<1x64xf32, #tpu.memory_space<vmem>>, %arg8: memref<64x128xbf16, #tpu.memory_space<vmem>>, %arg9: memref<1x128xf32, #tpu.memory_space<vmem>>, %arg10: memref<32x128xbf16, #tpu.memory_space<vmem>>) attributes {dimension_semantics = [#tpu.dimension_semantics<parallel>], iteration_bounds = array<i64: 2>, scalar_prefetch = 0 : i64, scratch_operands = 0 : i64, tpu.core_type = #tpu.core_type<tc>, window_params = [{transform_indices = @transform_0, window_bounds = array<i64: 32, 784>}, {pipeline_mode = #tpu.pipeline_mode<synchronous>, transform_indices = @transform_1, window_bounds = array<i64: 784, 256>}, {pipeline_mode = #tpu.pipeline_mode<synchronous>, transform_indices = @transform_2, window_bounds = array<i64: 1, 256>}, {pipeline_mode = #tpu.pipeline_mode<synchronous>, transform_indices = @transform_3, window_bounds = array<i64: 256, 128>}, {pipeline_mode = #tpu.pipeline_mode<synchronous>, transform_indices = @transform_4, window_bounds = array<i64: 1, 128>}, {pipeline_mode = #tpu.pipeline_mode<synchronous>, transform_indices = @transform_5, window_bounds = array<i64: 128, 64>}, {pipeline_mode = #tpu.pipeline_mode<synchronous>, transform_indices = @transform_6, window_bounds = array<i64: 1, 64>}, {pipeline_mode = #tpu.pipeline_mode<synchronous>, transform_indices = @transform_7, window_bounds = array<i64: 64, 128>}, {pipeline_mode = #tpu.pipeline_mode<synchronous>, transform_indices = @transform_8, window_bounds = array<i64: 1, 128>}, {transform_indices = @transform_9, window_bounds = array<i64: 32, 128>}]} {
    %c0 = arith.constant 0 : index
    %c0_0 = arith.constant 0 : index
    %0 = vector.load %arg1[%c0, %c0_0] : memref<32x784xf32, #tpu.memory_space<vmem>>, vector<32x784xf32>
    %1 = arith.truncf %0 : vector<32x784xf32> to vector<32x784xbf16>
    %c0_1 = arith.constant 0 : index
    %c0_2 = arith.constant 0 : index
    %2 = vector.load %arg2[%c0_1, %c0_2] : memref<784x256xbf16, #tpu.memory_space<vmem>>, vector<784x256xbf16>
    %cst = arith.constant dense<0.000000e+00> : vector<32x256xf32>
    %3 = tpu.matmul %1, %2, %cst {dimension_numbers = #tpu.dot_dimension_numbers<[1], [0], [0], [1], [0, 0, 1, 1], [], []>} : vector<32x784xbf16>, vector<784x256xbf16>, vector<32x256xf32> -> vector<32x256xf32>
    %c0_3 = arith.constant 0 : index
    %c0_4 = arith.constant 0 : index
    %4 = vector.load %arg3[%c0_3, %c0_4] : memref<1x256xf32, #tpu.memory_space<vmem>>, vector<1x256xf32>
    %5 = vector.broadcast %4 : vector<1x256xf32> to vector<32x256xf32>
    %6 = arith.addf %3, %5 : vector<32x256xf32>
    %cst_5 = arith.constant 0.000000e+00 : f32
    %7 = vector.broadcast %cst_5 : f32 to vector<32x256xf32>
    %8 = arith.maximumf %6, %7 : vector<32x256xf32>
    %9 = arith.truncf %8 : vector<32x256xf32> to vector<32x256xbf16>
    %c0_6 = arith.constant 0 : index
    %c0_7 = arith.constant 0 : index
    %10 = vector.load %arg4[%c0_6, %c0_7] : memref<256x128xbf16, #tpu.memory_space<vmem>>, vector<256x128xbf16>
    %cst_8 = arith.constant dense<0.000000e+00> : vector<32x128xf32>
    %11 = tpu.matmul %9, %10, %cst_8 {dimension_numbers = #tpu.dot_dimension_numbers<[1], [0], [0], [1], [0, 0, 1, 1], [], []>} : vector<32x256xbf16>, vector<256x128xbf16>, vector<32x128xf32> -> vector<32x128xf32>
    %c0_9 = arith.constant 0 : index
    %c0_10 = arith.constant 0 : index
    %12 = vector.load %arg5[%c0_9, %c0_10] : memref<1x128xf32, #tpu.memory_space<vmem>>, vector<1x128xf32>
    %13 = vector.broadcast %12 : vector<1x128xf32> to vector<32x128xf32>
    %14 = arith.addf %11, %13 : vector<32x128xf32>
    %cst_11 = arith.constant 0.000000e+00 : f32
    %15 = vector.broadcast %cst_11 : f32 to vector<32x128xf32>
    %16 = arith.maximumf %14, %15 : vector<32x128xf32>
    %17 = arith.truncf %16 : vector<32x128xf32> to vector<32x128xbf16>
    %c0_12 = arith.constant 0 : index
    %c0_13 = arith.constant 0 : index
    %18 = vector.load %arg6[%c0_12, %c0_13] : memref<128x64xbf16, #tpu.memory_space<vmem>>, vector<128x64xbf16>
    %cst_14 = arith.constant dense<0.000000e+00> : vector<32x64xf32>
    %19 = tpu.matmul %17, %18, %cst_14 {dimension_numbers = #tpu.dot_dimension_numbers<[1], [0], [0], [1], [0, 0, 1, 1], [], []>} : vector<32x128xbf16>, vector<128x64xbf16>, vector<32x64xf32> -> vector<32x64xf32>
    %c0_15 = arith.constant 0 : index
    %c0_16 = arith.constant 0 : index
    %20 = vector.load %arg7[%c0_15, %c0_16] : memref<1x64xf32, #tpu.memory_space<vmem>>, vector<1x64xf32>
    %21 = vector.broadcast %20 : vector<1x64xf32> to vector<32x64xf32>
    %22 = arith.addf %19, %21 : vector<32x64xf32>
    %cst_17 = arith.constant 0.000000e+00 : f32
    %23 = vector.broadcast %cst_17 : f32 to vector<32x64xf32>
    %24 = arith.maximumf %22, %23 : vector<32x64xf32>
    %25 = arith.truncf %24 : vector<32x64xf32> to vector<32x64xbf16>
    %c0_18 = arith.constant 0 : index
    %c0_19 = arith.constant 0 : index
    %26 = vector.load %arg8[%c0_18, %c0_19] : memref<64x128xbf16, #tpu.memory_space<vmem>>, vector<64x128xbf16>
    %cst_20 = arith.constant dense<0.000000e+00> : vector<32x128xf32>
    %27 = tpu.matmul %25, %26, %cst_20 {dimension_numbers = #tpu.dot_dimension_numbers<[1], [0], [0], [1], [0, 0, 1, 1], [], []>} : vector<32x64xbf16>, vector<64x128xbf16>, vector<32x128xf32> -> vector<32x128xf32>
    %c0_21 = arith.constant 0 : index
    %c0_22 = arith.constant 0 : index
    %28 = vector.load %arg9[%c0_21, %c0_22] : memref<1x128xf32, #tpu.memory_space<vmem>>, vector<1x128xf32>
    %29 = vector.broadcast %28 : vector<1x128xf32> to vector<32x128xf32>
    %30 = arith.addf %27, %29 : vector<32x128xf32>
    %cst_23 = arith.constant dense<0xFF800000> : vector<32xf32>
    %31 = vector.multi_reduction <maximumf>, %30, %cst_23 [1] : vector<32x128xf32> to vector<32xf32>
    %32 = vector.shape_cast %31 : vector<32xf32> to vector<32x1xf32>
    %33 = vector.broadcast %32 : vector<32x1xf32> to vector<32x128xf32>
    %34 = arith.subf %30, %33 : vector<32x128xf32>
    %35 = math.exp %34 : vector<32x128xf32>
    %cst_24 = arith.constant dense<0.000000e+00> : vector<32xf32>
    %36 = vector.multi_reduction <add>, %35, %cst_24 [1] : vector<32x128xf32> to vector<32xf32>
    %37 = vector.shape_cast %36 : vector<32xf32> to vector<32x1xf32>
    %38 = math.log %37 : vector<32x1xf32>
    %39 = arith.addf %32, %38 : vector<32x1xf32>
    %40 = vector.broadcast %39 : vector<32x1xf32> to vector<32x128xf32>
    %41 = arith.subf %30, %40 : vector<32x128xf32>
    %42 = arith.truncf %41 : vector<32x128xf32> to vector<32x128xbf16>
    %c0_25 = arith.constant 0 : index
    %c0_26 = arith.constant 0 : index
    %43 = vector.load %arg10[%c0_25, %c0_26] : memref<32x128xbf16, #tpu.memory_space<vmem>>, vector<32x128xbf16>
    tpu.vector_store %arg10[%c0_25, %c0_26], %42 {strides = array<i32>} : memref<32x128xbf16, #tpu.memory_space<vmem>>, vector<32x128xbf16>,
    return
  }
  func.func @transform_0(%arg0: i32) -> (i32, i32) {
    %c0_i32 = arith.constant 0 : i32
    %c0_i32_0 = arith.constant 0 : i32
    return %arg0, %c0_i32 : i32, i32
  }
  func.func @transform_1(%arg0: i32) -> (i32, i32) {
    %c0_i32 = arith.constant 0 : i32
    %c0_i32_0 = arith.constant 0 : i32
    %c0_i32_1 = arith.constant 0 : i32
    return %c0_i32, %c0_i32_0 : i32, i32
  }
  func.func @transform_2(%arg0: i32) -> (i32, i32) {
    %c0_i32 = arith.constant 0 : i32
    %c0_i32_0 = arith.constant 0 : i32
    %c0_i32_1 = arith.constant 0 : i32
    return %c0_i32, %c0_i32_0 : i32, i32
  }
  func.func @transform_3(%arg0: i32) -> (i32, i32) {
    %c0_i32 = arith.constant 0 : i32
    %c0_i32_0 = arith.constant 0 : i32
    %c0_i32_1 = arith.constant 0 : i32
    return %c0_i32, %c0_i32_0 : i32, i32
  }
  func.func @transform_4(%arg0: i32) -> (i32, i32) {
    %c0_i32 = arith.constant 0 : i32
    %c0_i32_0 = arith.constant 0 : i32
    %c0_i32_1 = arith.constant 0 : i32
    return %c0_i32, %c0_i32_0 : i32, i32
  }
  func.func @transform_5(%arg0: i32) -> (i32, i32) {
    %c0_i32 = arith.constant 0 : i32
    %c0_i32_0 = arith.constant 0 : i32
    %c0_i32_1 = arith.constant 0 : i32
    return %c0_i32, %c0_i32_0 : i32, i32
  }
  func.func @transform_6(%arg0: i32) -> (i32, i32) {
    %c0_i32 = arith.constant 0 : i32
    %c0_i32_0 = arith.constant 0 : i32
    %c0_i32_1 = arith.constant 0 : i32
    return %c0_i32, %c0_i32_0 : i32, i32
  }
  func.func @transform_7(%arg0: i32) -> (i32, i32) {
    %c0_i32 = arith.constant 0 : i32
    %c0_i32_0 = arith.constant 0 : i32
    %c0_i32_1 = arith.constant 0 : i32
    return %c0_i32, %c0_i32_0 : i32, i32
  }
  func.func @transform_8(%arg0: i32) -> (i32, i32) {
    %c0_i32 = arith.constant 0 : i32
    %c0_i32_0 = arith.constant 0 : i32
    %c0_i32_1 = arith.constant 0 : i32
    return %c0_i32, %c0_i32_0 : i32, i32
  }
  func.func @transform_9(%arg0: i32) -> (i32, i32) {
    %c0_i32 = arith.constant 0 : i32
    %c0_i32_0 = arith.constant 0 : i32
    return %arg0, %c0_i32 : i32, i32
  }
}

</mosaic_0001>

<bundles_post_ra>
// kernel: tpu_custom_call.1
= control target key start
LH: loop header
LB: loop body
LE: loop exit
PB: predicated region body
PF: predicated region fallthrough
CT: control target
= control target key end

     0   :  { %s2850_s0 = inlined_call_operand.hbm [shape: f32[64,784], index: 0, kind: input, shape index: {}]   ;;  %s2851_s1 = inlined_call_operand.hbm [shape: bf16[784,256], index: 1, kind: input, shape index: {}]   ;;  %s2852_s2 = inlined_call_operand.vmem [shape: f32[1,256], index: 2, kind: input, shape index: {}]   ;;  %s2853_s3 = inlined_call_operand.hbm [shape: bf16[256,128], index: 3, kind: input, shape index: {}]   ;;  %s2854_s4 = inlined_call_operand.vmem [shape: f32[1,128], index: 4, kind: input, shape index: {}]   ;;  %s2855_s5 = inlined_call_operand.vmem [shape: bf16[128,64], index: 5, kind: input, shape index: {}]   ;;  %s2856_s6 = inlined_call_operand.vmem [shape: f32[1,64], index: 6, kind: input, shape index: {}]   ;;  %s2857_s7 = inlined_call_operand.vmem [shape: bf16[64,128], index: 7, kind: input, shape index: {}]   ;;  %s2858_s8 = inlined_call_operand.vmem [shape: f32[1,128], index: 8, kind: input, shape index: {}]   ;;  %s2859_s9 = inlined_call_operand.hbm [shape: bf16[64,128], index: 9, kind: output, shape index: {}]  }
   0x1   :  { %2864 = sst [smem:[#allocation13_spill]] %s2851_s1 }
   0x2   :  { %2865 = sst [smem:[#allocation14_spill]] %s2853_s3 }
   0x3   :  { %14 = vsyncpa [#allocation3], 0 }
   0x4   :  { %16 = vsyncpa [#allocation3 + $0x1], 0 }
   0x5   :  { %17 = vsyncpa [#allocation6], 0 }
   0x6   :  { %18 = vsyncpa [#allocation4], 0 }
   0x7   :  { %20 = vsyncpa [#allocation4 + $0x1], 0  ;;  %s2567_s30 = smov 0   ;;  %s2569_s10 = smov 0  }
   0x8   :  { %s2571_s11 = smov 0   ;;  %s2573_s12 = smov 0  }
   0x9 LB: > { %s2588_s13 = sadd.s32 4294967295, %s2502_s12   ;;  %s1838_s14 = sadd.s32 4294967294, %s2502_s12   ;;  %s2502_s12 = sphi %s2573_s12, %s2887_s12   ;;  %s2498_s11 = sphi %s2571_s11, %s2886_s11   ;;  %s2494_s10 = sphi %s2569_s10, %s2885_s10   ;;  %s2490_s30 = sphi %s2567_s30, %s2884_s30  }
   0xa   : > { %p46_p0 = scmp.ne.s32.totalorder %s2494_s10, %s2490_s30  ;;  %p2860_p1 = scmp.eq.s32.totalorder %s2588_s13, 0 }
   0xb   : > { %p244_p3 = scmp.eq.s32.totalorder %s1838_s14, 1  ;;  %p1839_p5 = scmp.ge.s32.totalorder %s2502_s12, 1 }
   0xc   : > { %p2597_p4 = por %p2860_p1, %p46_p0  ;;  %p251_p7 = scmp.lt.s32.totalorder %s2502_s12, 3 }
   0xd   : > { %p2602_p6 = por %p244_p3, %p46_p0  ;;  %s2504_s18 = smov [#allocation5]  }
   0xe   : > { %s2866_s15 = scalar_select %p2597_p4, 1, 0 }
   0xf   : > { %s2867_s16 = scalar_select %p2602_p6, 1, 0 }
  0x10   : > { %p2607_p8 = pnand %p1839_p5, %p251_p7  ;;  %s263_s19 = sshll.u32 %s2504_s18, 4  ;;  %s264_s19 = int_to_ptr.vmem [resolvable:$true] %s263_s19 }
  0x11   : > { %s2505_s21 = smov [#allocation7]   ;;  %s2365_s23 = scalar_lea.vmem %s264_s19, 12544 }
  0x12   : > { %s2868_s17 = scalar_select %p2607_p8, 1, 0 }
  0x13   : > { %p2099_p9 = pneg %p2607_p8  ;;  %s279_s22 = sshll.u32 %s2505_s21, 4  ;;  %s280_s22 = int_to_ptr.vmem [resolvable:$true] %s279_s22 }
  0x14   : > { %p2366_p13 = scmp.ne.s32.totalorder %s264_s19, %s2365_s23  ;;  %p2373_p5 = scmp.lt.s32.totalorder %s264_s19, %s264_s19 }
  0x15   : > { %p2616_p11 = pnand %p2099_p9, %p2860_p1  ;;  %p2374_p7 = scmp.lt.s32.totalorder %s2365_s23, %s2365_s23 }
  0x17   : > { %p2356_p12 = pneg %p2616_p11  ;;  %p2375_p10 = por %p2374_p7, %p2373_p5 }
  0x19   : > { %p2368_p0 = pnand %p2366_p13, %p2356_p12 }
  0x1b   : > { %p2369_p3 = pneg %p2368_p0 }
  0x1d   : > { %p2376_p9 = pnand %p2375_p10, %p2369_p3 }
  0x1f   : > { %2379 = shalt.err (!%p2376_p9)
}
  0x20   : > { %s2506_s24 = smov 128   ;;  %s2507_s25 = smov 8  }
  0x21   : > { %s2870_s1 = sld [smem:[#allocation13_spill]]  ;;  %s2391_s28 = scalar_lea.vmem %s280_s22, 2048 }
  0x22   : > { %p2392_p1 = scmp.ne.s32.totalorder %s280_s22, %s2391_s28  ;;  %p2399_p2 = scmp.lt.s32.totalorder %s280_s22, %s280_s22 }
  0x23   : > { %p2400_p6 = scmp.lt.s32.totalorder %s2391_s28, %s2391_s28 }
  0x24   : > { %p2394_p13 = pnand %p2392_p1, %p2356_p12 }
  0x25   : > { %p2401_p5 = por %p2400_p6, %p2399_p2 }
  0x26   : > { %p2395_p0 = pneg %p2394_p13 }
  0x27   : > { %2102 = dma.hbm_to_vmem [thread:$0]  (!%p2616_p11), %s2870_s1, 12544, %s264_s19, [#allocation6], %s2506_s24, %s2506_s24, %s2507_s25  }
  0x28   : > { %p2402_p10 = pnand %p2401_p5, %p2395_p0 }
  0x2a   : > { %2405 = shalt.err (!%p2402_p10)
}
  0x2b   : > { %s2508_s29 = smov 64   ;;  %s2509_s14 = smov 4  }
  0x2c   : > { %s2871_s3 = sld [smem:[#allocation14_spill]]  ;;  %s2639_s21 = sadd.s32 1, %s2502_s12  }
  0x2d   : > { %s30_s23 = ssub.s32 %s2502_s12, %s2639_s21  ;;  %s33_s24 = sadd.s32 1, %s2498_s11 }
  0x2e   : > { %p31_p1 = scmp.eq.s32.totalorder %s30_s23, 0  ;;  %p40_p2 = scmp.ne.s32.totalorder %s2498_s11, %s2494_s10 }
  0x2f   : > { %p41_p6 = scmp.eq.s32.totalorder %s2502_s12, 0  ;;  %p2873_p3 = scmp.eq.s32.totalorder %s2588_s13, 1 }
  0x30   : > { %s2648_s25 = scalar_select %p31_p1, %s2498_s11, %s33_s24  }
  0x31   : > { %p42_p12 = por %p41_p6, %p40_p2  ;;  %p2652_p7 = por %p2873_p3, %p40_p2 }
  0x32   : > { %2105 = dma.hbm_to_vmem [thread:$0]  (!%p2616_p11), %s2871_s3, 2048, %s280_s22, [#allocation6], %s2508_s29, %s2508_s29, %s2509_s14  }
  0x33   : > { %2872 = sst [smem:[#allocation12_spill]] %s2648_s25  ;;  %p2116_p9 = scmp.lt.s32.totalorder %s2502_s12, 2 }
  0x34   : > { %s2874_s26 = scalar_select %p2652_p7, 1, 0 }
  0x35   : > { %s308_s20 = sand.u32 1, %s2498_s11   ;;  %s2085_s22 = smul.u32 3584, %s2502_s12 }
  0x36   : > { %s2084_s27 = smul.u32 224, %s308_s20  ;;  %p2659_p11 = pnand %p2116_p9, %p42_p12 }
  0x37   : > { %s2666_s18 = scalar_lea.hbm %s2850_s0, %s2085_s22  ;;  %s2670_s24 = scalar_lea.sflag [#allocation3], %s308_s20 }
  0x38   : > { %s312_s19 = scalar_lea.vmem [#allocation2], %s2084_s27  ;;  %s2406_s1 = scalar_lea.hbm %s2666_s18, 3584 }
  0x39   : > { %s320_s23 = sshll.u32 %s312_s19, 4  ;;  %p2407_p13 = scmp.ne.s32.totalorder %s2666_s18, %s2406_s1  ;;  %s2668_s23 = int_to_ptr.vmem [resolvable:$true] %s320_s23 }
  0x3a   : > { %p2408_p0 = pneg %p2659_p11  ;;  %s2411_s22 = scalar_lea.hbm %s2850_s0, 7168 }
  0x3b   : > { %p2412_p1 = scmp.lt.s32.totalorder %s2666_s18, %s2850_s0  ;;  %p2413_p2 = scmp.lt.s32.totalorder %s2411_s22, %s2406_s1 }
  0x3c   : > { %p2409_p5 = pnand %p2408_p0, %p2407_p13 }
  0x3d   : > { %p2414_p6 = por %p2413_p2, %p2412_p1 }
  0x3e   : > { %p2410_p10 = pneg %p2409_p5 }
  0x40   : > { %p2415_p12 = pnand %p2414_p6, %p2410_p10 }
  0x42   : > { %2418 = shalt.err (!%p2415_p12)
}
  0x43   : > { %s2419_s20 = scalar_lea.vmem %s2668_s23, 3584  ;;  %s2510_s27 = smov [#allocation2]  }
  0x44   : > { %p2420_p3 = scmp.ne.s32.totalorder %s2668_s23, %s2419_s20  ;;  %s2424_s19 = sshll.u32 %s2510_s27, 4  ;;  %s2425_s19 = int_to_ptr.vmem [resolvable:$false] %s2424_s19 }
  0x45   : > { %s2426_s3 = scalar_lea.vmem %s2425_s19, 7168  ;;  %p2427_p5 = scmp.lt.s32.totalorder %s2668_s23, %s2425_s19 }
  0x46   : > { %p2422_p9 = pnand %p2420_p3, %p2408_p0  ;;  %p2428_p7 = scmp.lt.s32.totalorder %s2426_s3, %s2419_s20 }
  0x48   : > { %p2423_p13 = pneg %p2422_p9  ;;  %p2429_p4 = por %p2428_p7, %p2427_p5 }
  0x4a   : > { %p2430_p8 = pnand %p2429_p4, %p2423_p13 }
  0x4c   : > { %2433 = shalt.err (!%p2430_p8)
}
  0x4d   : > { %s2511_s1 = smov 896   ;;  %s2512_s25 = smov 56  }
  0x4e   : > { %2109 = dma.hbm_to_vmem [thread:$0]  (!%p2659_p11), %s2666_s18, 3584, %s2668_s23, %s2670_s24, %s2511_s1, %s2511_s1, %s2512_s25  }
  0x4f   : > { %p2876_p0 = scmp.ne.s32.totalorder %s2868_s17, 0 }
  0x50   : > { %s2694_s29 = sand.u32 (!%p2876_p0), 1, %s2494_s10   ;;  %p2877_p4 = scmp.ne.s32.totalorder (!%p2876_p0), %s2866_s15, 0 }
  0x51   : > { %332 = sbr.rel (%p2876_p0) target bundleno = 1383 (0x567), region = 56  ;;  %s335_s14 = scalar_lea.sflag (!%p2876_p0), [#allocation3], %s2694_s29 }
  0x52   : > { %s2086_s22 = smul.u32 (!%p2876_p0), 224, %s2694_s29 }
  0x54   : > { %s2698_s20 = scalar_lea.vmem (!%p2876_p0), [#allocation2], %s2086_s22 }
  0x56   : > { %2477 = dma.done.wait (%p2877_p4), %s335_s14, 3584  }
  0x57   : > { %2479 = vsyncadd (%p2877_p4), %s335_s14, 4294963712  ;;  %p2878_p8 = scmp.eq.s32.totalorder %s2588_s13, 0 }
  0x59   : > { %2481 = dma.done.wait (%p2878_p8), [#allocation6], 14592   ;;  %p2879_p7 = pmov %p2878_p8 }
  0x5a   : > { %v2163_v0 = vld [vmem:[#allocation5 + $0x74] ss:$8 sps:$4 sm:$0xff]   ;;  %v2165_v1 = vld [vmem:[#allocation5 + $0x70] ss:$8 sps:$4 sm:$0xff]   ;;  %v2169_v4 = vld [vmem:[#allocation5 + $0x64] ss:$8 sps:$4 sm:$0xff]  }
  0x5b   : > { %2483 = vsyncadd (%p2879_p7), [#allocation6], 4294952704  ;;  %1033 = vmatprep.subr.bf16.mxu0 %v2163_v0  ;;  %v2166_v2 = vld [vmem:[#allocation5 + $0x174] ss:$8 sps:$4 sm:$0xff]   ;;  %v2168_v3 = vld [vmem:[#allocation5 + $0x170] ss:$8 sps:$4 sm:$0xff]  }
  0x5c   : > { %1034 = vmatpush1.bf16.msra.mxu0 %v2165_v1  ;;  %v2171_v5 = vld [vmem:[#allocation5 + $0x60] ss:$8 sps:$4 sm:$0xff]   ;;  %1086 = vmatprep.subr.bf16.mxu1 %v2166_v2  ;;  %v2172_v6 = vld [vmem:[#allocation5 + $0x164] ss:$8 sps:$4 sm:$0xff]   ;;  %v2175_v8 = vld [vmem:[#allocation5 + $0x54] ss:$8 sps:$4 sm:$0xff]  }
  0x5d   : > { %1087 = vmatpush1.bf16.msra.mxu1 %v2168_v3  ;;  %1035 = vmatprep.subr.bf16.mxu0 %v2169_v4  ;;  %v2174_v7 = vld [vmem:[#allocation5 + $0x160] ss:$8 sps:$4 sm:$0xff]   ;;  %v2177_v9 = vld [vmem:[#allocation5 + $0x50] ss:$8 sps:$4 sm:$0xff]   ;;  %v2178_v10 = vld [vmem:[#allocation5 + $0x154] ss:$8 sps:$4 sm:$0xff]  }
  0x5e   : > { %1088 = vmatprep.subr.bf16.mxu1 %v2172_v6  ;;  %v2181_v11 = vld [vmem:[#allocation5 + $0x44] ss:$8 sps:$4 sm:$0xff]   ;;  %v2180_v12 = vld [vmem:[#allocation5 + $0x150] ss:$8 sps:$4 sm:$0xff]   ;;  %v2183_v14 = vld [vmem:[#allocation5 + $0x40] ss:$8 sps:$4 sm:$0xff]  }
  0x5f   : > { %v2184_v13 = vld [vmem:[#allocation5 + $0x144] ss:$8 sps:$4 sm:$0xff]   ;;  %v2187_v15 = vld [vmem:[#allocation5 + $0x34] ss:$8 sps:$4 sm:$0xff]   ;;  %v2186_v16 = vld [vmem:[#allocation5 + $0x140] ss:$8 sps:$4 sm:$0xff]  }
  0x60   : > { %1036 = vmatpush1.bf16.msra.mxu0 %v2171_v5  ;;  %v2190_v17 = vld [vmem:[#allocation5 + $0x134] ss:$8 sps:$4 sm:$0xff]   ;;  %v2189_v18 = vld [vmem:[#allocation5 + $0x30] ss:$8 sps:$4 sm:$0xff]   ;;  %v2193_v19 = vld [vmem:[#allocation5 + $0x24] ss:$8 sps:$4 sm:$0xff]  }
  0x61   : > { %1037 = vmatprep.subr.bf16.mxu0 %v2175_v8  ;;  %1089 = vmatpush1.bf16.msra.mxu1 %v2174_v7  ;;  %v2192_v20 = vld [vmem:[#allocation5 + $0x130] ss:$8 sps:$4 sm:$0xff]   ;;  %v2196_v21 = vld [vmem:[#allocation5 + $0x124] ss:$8 sps:$4 sm:$0xff]   ;;  %v2195_v22 = vld [vmem:[#allocation5 + $0x20] ss:$8 sps:$4 sm:$0xff]  }
  0x62   : > { %1090 = vmatprep.subr.bf16.mxu1 %v2178_v10  ;;  %v2199_v23 = vld [vmem:[#allocation5 + $0x14] ss:$8 sps:$4 sm:$0xff]   ;;  %v2198_v24 = vld [vmem:[#allocation5 + $0x120] ss:$8 sps:$4 sm:$0xff]   ;;  %v2201_v26 = vld [vmem:[#allocation5 + $0x10] ss:$8 sps:$4 sm:$0xff]  }
  0x63   : > { %v2202_v25 = vld [vmem:[#allocation5 + $0x114] ss:$8 sps:$4 sm:$0xff]   ;;  %v2205_v27 = vld [vmem:[#allocation5 + $0x4] ss:$8 sps:$4 sm:$0xff]   ;;  %v2204_v28 = vld [vmem:[#allocation5 + $0x110] ss:$8 sps:$4 sm:$0xff]  }
  0x64   : > { %1038 = vmatpush1.bf16.msra.mxu0 %v2177_v9  ;;  %v2208_v29 = vld [vmem:[#allocation5 + $0x104] ss:$8 sps:$4 sm:$0xff]   ;;  %v2207_v30 = vld [vmem:[#allocation5] ss:$8 sps:$4 sm:$0xff]   ;;  %v2211_v31 = vld [vmem:[#allocation5 + $0xf4] ss:$8 sps:$4 sm:$0xff]  }
  0x65   : > { %1039 = vmatprep.subr.bf16.mxu0 %v2181_v11  ;;  %1091 = vmatpush1.bf16.msra.mxu1 %v2180_v12  ;;  %v2210_v32 = vld [vmem:[#allocation5 + $0x100] ss:$8 sps:$4 sm:$0xff]   ;;  %v2214_v33 = vld [vmem:[#allocation5 + $0x1f4] ss:$8 sps:$4 sm:$0xff]   ;;  %v2213_v34 = vld [vmem:[#allocation5 + $0xf0] ss:$8 sps:$4 sm:$0xff]  }
  0x66   : > { %1092 = vmatprep.subr.bf16.mxu1 %v2184_v13  ;;  %v2217_v35 = vld [vmem:[#allocation5 + $0xe4] ss:$8 sps:$4 sm:$0xff]   ;;  %v2216_v36 = vld [vmem:[#allocation5 + $0x1f0] ss:$8 sps:$4 sm:$0xff]   ;;  %v2219_v38 = vld [vmem:[#allocation5 + $0xe0] ss:$8 sps:$4 sm:$0xff]  }
  0x67   : > { %v2220_v37 = vld [vmem:[#allocation5 + $0x1e4] ss:$8 sps:$4 sm:$0xff]   ;;  %v2223_v39 = vld [vmem:[#allocation5 + $0xd4] ss:$8 sps:$4 sm:$0xff]   ;;  %v2222_v40 = vld [vmem:[#allocation5 + $0x1e0] ss:$8 sps:$4 sm:$0xff]  }
  0x68   : > { %1040 = vmatpush1.bf16.msra.mxu0 %v2183_v14  ;;  %v2226_v41 = vld [vmem:[#allocation5 + $0x1d4] ss:$8 sps:$4 sm:$0xff]   ;;  %v2225_v42 = vld [vmem:[#allocation5 + $0xd0] ss:$8 sps:$4 sm:$0xff]   ;;  %v2229_v43 = vld [vmem:[#allocation5 + $0xc4] ss:$8 sps:$4 sm:$0xff]  }
  0x69   : > { %1041 = vmatprep.subr.bf16.mxu0 %v2187_v15  ;;  %1093 = vmatpush1.bf16.msra.mxu1 %v2186_v16  ;;  %v2228_v44 = vld [vmem:[#allocation5 + $0x1d0] ss:$8 sps:$4 sm:$0xff]   ;;  %v2232_v45 = vld [vmem:[#allocation5 + $0x1c4] ss:$8 sps:$4 sm:$0xff]   ;;  %v2231_v48 = vld [vmem:[#allocation5 + $0xc0] ss:$8 sps:$4 sm:$0xff]  }
  0x6a   : > { %1094 = vmatprep.subr.bf16.mxu1 %v2190_v17  ;;  %v385_v46 = vld [vmem:[%s2698_s20 + $0x8] sm:$0xff]  ;;  %v392_v47 = vld [vmem:[%s2698_s20 + $0x40] sm:$0xff]  ;;  %v2235_v50 = vld [vmem:[#allocation5 + $0xb4] ss:$8 sps:$4 sm:$0xff]   ;;  %vm1026_vm0 = vcmask 130048   ;;  %vm1612_vm1 = vcmask 523264  }
  0x6b   : > { %v413_v49 = vpack.c.bf16 %v392_v47, %v385_v46  ;;  %v2234_v51 = vld [vmem:[#allocation5 + $0x1c0] ss:$8 sps:$4 sm:$0xff]   ;;  %v387_v52 = vld [vmem:[%s2698_s20 + $0x18] sm:$0xff]  ;;  %v394_v53 = vld [vmem:[%s2698_s20 + $0x50] sm:$0xff]  ;;  %s1849_s23 = sshll.u32 %s2694_s29, 4  ;;  %s1996_s24 = sshll.u32 %s2588_s13, 8 }
  0x6c   : > { %1042 = vmatpush1.bf16.msra.mxu0 %v2189_v18  ;;  %v2238_v54 = vld [vmem:[#allocation5 + $0x1b4] ss:$8 sps:$4 sm:$0xff]   ;;  %v415_v55 = vpack.c.bf16 %v394_v53, %v387_v52  ;;  %v2237_v56 = vld [vmem:[#allocation5 + $0xb0] ss:$8 sps:$4 sm:$0xff]   ;;  %v2241_v57 = vld [vmem:[#allocation5 + $0xa4] ss:$8 sps:$4 sm:$0xff]   ;;  %s2805_s25 = scalar_lea.hbm %s2859_s9, %s1996_s24 }
  0x6d   : > { %1043 = vmatprep.subr.bf16.mxu0 %v2193_v19  ;;  %1095 = vmatpush1.bf16.msra.mxu1 %v2192_v20  ;;  %v2240_v58 = vld [vmem:[#allocation5 + $0x1b0] ss:$8 sps:$4 sm:$0xff]   ;;  %v2244_v59 = vld [vmem:[#allocation5 + $0x1a4] ss:$8 sps:$4 sm:$0xff]   ;;  %v2243_v60 = vld [vmem:[#allocation5 + $0xa0] ss:$8 sps:$4 sm:$0xff]  }
  0x6e   : > { %1096 = vmatprep.subr.bf16.mxu1 %v2196_v21  ;;  %1065 = vmatprep.mubr.bf16.mxu0 %v413_v49  ;;  %v2247_v61 = vld [vmem:[#allocation5 + $0x94] ss:$8 sps:$4 sm:$0xff]   ;;  %v2246_v62 = vld [vmem:[#allocation5 + $0x1a0] ss:$8 sps:$4 sm:$0xff]   ;;  %v2249_v0 = vld [vmem:[#allocation5 + $0x90] ss:$8 sps:$4 sm:$0xff]  }
  0x6f   : > { %1118 = vmatprep.mubr.bf16.mxu1 %v415_v55  ;;  %v2250_v63 = vld [vmem:[#allocation5 + $0x194] ss:$8 sps:$4 sm:$0xff]   ;;  %v2252_v1 = vld [vmem:[#allocation5 + $0x190] ss:$8 sps:$4 sm:$0xff]   ;;  %v2253_v2 = vld [vmem:[#allocation5 + $0x84] ss:$8 sps:$4 sm:$0xff]  }
  0x70   : > { %1044 = vmatpush1.bf16.msra.mxu0 %v2195_v22  ;;  %v2255_v3 = vld [vmem:[#allocation5 + $0x80] ss:$8 sps:$4 sm:$0xff]   ;;  %v2256_v4 = vld [vmem:[#allocation5 + $0x184] ss:$8 sps:$4 sm:$0xff]   ;;  %v391_v7 = vld [vmem:[%s2698_s20 + $0x38] sm:$0xff]  ;;  %s380_s27 = scalar_lea.vmem [#allocation8], %s1849_s23 }
  0x71   : > { %1045 = vmatprep.subr.bf16.mxu0 %v2199_v23  ;;  %1097 = vmatpush1.bf16.msra.mxu1 %v2198_v24  ;;  %v384_v5 = vld [vmem:[%s2698_s20] sm:$0xff]  ;;  %v2261_v8 = vld [vmem:[#allocation5 + $0x274] ss:$8 sps:$4 sm:$0xff]   ;;  %v393_v10 = vld [vmem:[%s2698_s20 + $0x48] sm:$0xff]  ;;  %s1746_s19 = sshll.u32 %s380_s27, 4  ;;  %s1733_s13 = scalar_lea.sflag [#allocation4], %s2694_s29  ;;  %s2807_s19 = int_to_ptr.vmem [resolvable:$true] %s1746_s19 }
  0x72   : > { %1098 = vmatprep.subr.bf16.mxu1 %v2202_v25  ;;  %v2258_v6 = vld [vmem:[#allocation5 + $0x180] ss:$8 sps:$4 sm:$0xff]   ;;  %v386_v9 = vld [vmem:[%s2698_s20 + $0x10] sm:$0xff]  ;;  %v412_v11 = vpack.c.bf16 %v391_v7, %v384_v5  ;;  %v399_v13 = vld [vmem:[%s2698_s20 + $0x78] sm:$0xff]  ;;  %s2434_s22 = scalar_lea.vmem %s2807_s19, 256  ;;  %p2880_p10 = scmp.ne.s32.totalorder %s2874_s26, 0 }
  0x73   : > { %v2259_v12 = vld [vmem:[#allocation5 + $0x270] ss:$8 sps:$4 sm:$0xff]   ;;  %v414_v15 = vpack.c.bf16 %v393_v10, %v386_v9  ;;  %v2264_v16 = vld [vmem:[#allocation5 + $0x264] ss:$8 sps:$4 sm:$0xff]   ;;  %v2298_v19 = vld [vmem:[#allocation5 + $0x300] ss:$8 sps:$4 sm:$0xff]   ;;  %p2435_p11 = scmp.ne.s32.totalorder %s2807_s19, %s2434_s22 }
  0x74   : > { %1046 = vmatpush1.bf16.msra.mxu0 %v2201_v26  ;;  %v406_v14 = vld [vmem:[%s2698_s20 + $0xb0] sm:$0xff]  ;;  %v2300_v18 = vld [vmem:[#allocation5 + $0x304] ss:$8 sps:$4 sm:$0xff]   ;;  %v2262_v22 = vld [vmem:[#allocation5 + $0x260] ss:$8 sps:$4 sm:$0xff]   ;;  %s2514_s14 = smov [#allocation8]  }
  0x75   : > { %1047 = vmatprep.subr.bf16.mxu0 %v2205_v27  ;;  %1099 = vmatpush1.bf16.msra.mxu1 %v2204_v28  ;;  %v420_v17 = vpack.c.bf16 %v406_v14, %v399_v13  ;;  %v401_v20 = vld [vmem:[%s2698_s20 + $0x88] sm:$0xff]  ;;  %v408_v21 = vld [vmem:[%s2698_s20 + $0xc0] sm:$0xff]  ;;  %v2267_v23 = vld [vmem:[#allocation5 + $0x254] ss:$8 sps:$4 sm:$0xff]   ;;  %p2436_p1 = pnand %p2435_p11, %p2880_p10 }
  0x76   : > { %1100 = vmatprep.subr.bf16.mxu1 %v2208_v29  ;;  %v422_v24 = vpack.c.bf16 %v408_v21, %v401_v20  ;;  %v398_v25 = vld [vmem:[%s2698_s20 + $0x70] sm:$0xff]  ;;  %v405_v26 = vld [vmem:[%s2698_s20 + $0xa8] sm:$0xff]  ;;  %v400_v27 = vld [vmem:[%s2698_s20 + $0x80] sm:$0xff] }
  0x77   : > { %v407_v28 = vld [vmem:[%s2698_s20 + $0xb8] sm:$0xff]  ;;  %v419_v29 = vpack.c.bf16 %v405_v26, %v398_v25  ;;  %v404_v46 = vld [vmem:[%s2698_s20 + $0xa0] sm:$0xff]  ;;  %v410_v7 = vld [vmem:[%s2698_s20 + $0xd0] sm:$0xff]  ;;  %p2437_p2 = pneg %p2436_p1 }
  0x78   : > { %1048 = vmatpush1.bf16.msra.mxu0 %v2207_v30  ;;  %v2265_v30 = vld [vmem:[#allocation5 + $0x250] ss:$8 sps:$4 sm:$0xff]   ;;  %v2282_v49 = vld [vmem:[#allocation5 + $0x204] ss:$8 sps:$4 sm:$0xff]   ;;  %v2285_v52 = vld [vmem:[#allocation5 + $0x2f4] ss:$8 sps:$4 sm:$0xff]  }
  0x79   : > { %1049 = vmatprep.subr.bf16.mxu0 %v2211_v31  ;;  %1101 = vmatpush1.bf16.msra.mxu1 %v2210_v32  ;;  %v389_v31 = vld [vmem:[%s2698_s20 + $0x28] sm:$0xff]  ;;  %v396_v32 = vld [vmem:[%s2698_s20 + $0x60] sm:$0xff]  ;;  %v411_v47 = vld [vmem:[%s2698_s20 + $0xd8] sm:$0xff] }
  0x7a   : > { %1102 = vmatprep.subr.bf16.mxu1 %v2214_v33  ;;  %v2270_v33 = vld [vmem:[#allocation5 + $0x244] ss:$8 sps:$4 sm:$0xff]   ;;  %v2283_v53 = vld [vmem:[#allocation5 + $0x2f0] ss:$8 sps:$4 sm:$0xff]   ;;  %v2286_v55 = vld [vmem:[#allocation5 + $0x2e0] ss:$8 sps:$4 sm:$0xff]  }
  0x7b   : > { %v395_v5 = vld [vmem:[%s2698_s20 + $0x58] sm:$0xff]  ;;  %v402_v10 = vld [vmem:[%s2698_s20 + $0x90] sm:$0xff]  ;;  %v2310_v13 = vld [vmem:[#allocation7 + $0x78] sm:$0xff]  }
  0x7c   : > { %1050 = vmatpush2.bf16.msra.mxu0 %v2213_v34  ;;  %v421_v34 = vpack.c.bf16 %v407_v28, %v400_v27  ;;  %v2311_v14 = vld [vmem:[#allocation7 + $0x38] sm:$0xff]   ;;  %v2317_v20 = vld [vmem:[#allocation7 + $0x20] sm:$0xff]   ;;  %v2322_v25 = vld [vmem:[#allocation7 + $0x48] sm:$0xff]  }
  0x7d   : > { %1051 = vmatprep.subr.bf16.mxu0 %v2217_v35  ;;  %1103 = vmatpush2.bf16.msra.mxu1 %v2216_v36  ;;  %v417_v35 = vpack.c.bf16 %v396_v32, %v389_v31  ;;  %v2268_v36 = vld [vmem:[#allocation5 + $0x240] ss:$8 sps:$4 sm:$0xff]   ;;  %v2323_v26 = vld [vmem:[#allocation7 + $0x8] sm:$0xff]   ;;  %v2324_v27 = vld [vmem:[#allocation7 + $0x40] sm:$0xff]  }
  0x7e   : > { %1104 = vmatprep.subr.bf16.mxu1 %v2220_v37  ;;  %v2273_v37 = vld [vmem:[#allocation5 + $0x234] ss:$8 sps:$4 sm:$0xff]   ;;  %v2318_v21 = vld [vmem:[#allocation7 + $0x58] sm:$0xff]  }
  0x7f   : > { %v2325_v28 = vld [vmem:[#allocation7] sm:$0xff]  }
  0x80   : > { %1052 = vmatpush2.bf16.msra.mxu0 %v2219_v38  ;;  %v390_v38 = vld [vmem:[%s2698_s20 + $0x30] sm:$0xff] }
  0x81   : > { %1053 = vmatprep.subr.bf16.mxu0 %v2223_v39  ;;  %1105 = vmatpush2.bf16.msra.mxu1 %v2222_v40  ;;  %v397_v39 = vld [vmem:[%s2698_s20 + $0x68] sm:$0xff]  ;;  %v2271_v40 = vld [vmem:[#allocation5 + $0x230] ss:$8 sps:$4 sm:$0xff]  }
  0x82   : > { %1106 = vmatprep.subr.bf16.mxu1 %v2226_v41  ;;  %v2513_v41 = vmov 0  }
  0x84   : > { %1054 = vmatpush2.bf16.msra.mxu0 %v2225_v42  ;;  %v2276_v42 = vld [vmem:[#allocation5 + $0x224] ss:$8 sps:$4 sm:$0xff]  }
  0x85   : > { %1055 = vmatprep.subr.bf16.mxu0 %v2229_v43  ;;  %1107 = vmatpush2.bf16.msra.mxu1 %v2228_v44  ;;  %v418_v43 = vpack.c.bf16 %v397_v39, %v390_v38  ;;  %v2274_v44 = vld [vmem:[#allocation5 + $0x220] ss:$8 sps:$4 sm:$0xff]  }
  0x86   : > { %1108 = vmatprep.subr.bf16.mxu1 %v2232_v45  ;;  %v2279_v45 = vld [vmem:[#allocation5 + $0x214] ss:$8 sps:$4 sm:$0xff]  }
  0x88   : > { %1056 = vmatpush2.bf16.msra.mxu0 %v2231_v48  ;;  %v2277_v48 = vld [vmem:[#allocation5 + $0x210] ss:$8 sps:$4 sm:$0xff]  }
  0x89   : > { %1057 = vmatprep.subr.bf16.mxu0 %v2235_v50  ;;  %1109 = vmatpush2.bf16.msra.mxu1 %v2234_v51  ;;  %v425_v50 = vpack.c.bf16 %v411_v47, %v404_v46  ;;  %v2280_v51 = vld [vmem:[#allocation5 + $0x200] ss:$8 sps:$4 sm:$0xff]  }
  0x8a   : > { %1110 = vmatprep.subr.bf16.mxu1 %v2238_v54  ;;  %v2288_v54 = vld [vmem:[#allocation5 + $0x2e4] ss:$8 sps:$4 sm:$0xff]   ;;  %v524_v47 = vld [vmem:[%s2852_s2] sm:$0x3] }
  0x8c   : > { %1058 = vmatpush2.bf16.msra.mxu0 %v2237_v56  ;;  %v2291_v56 = vld [vmem:[#allocation5 + $0x2d4] ss:$8 sps:$4 sm:$0xff]  }
  0x8d   : > { %1059 = vmatprep.subr.bf16.mxu0 %v2241_v57  ;;  %1111 = vmatpush2.bf16.msra.mxu1 %v2240_v58  ;;  %v2289_v57 = vld [vmem:[#allocation5 + $0x2d0] ss:$8 sps:$4 sm:$0xff]   ;;  %v2294_v58 = vld [vmem:[#allocation5 + $0x2c4] ss:$8 sps:$4 sm:$0xff]  }
  0x8e   : > { %1112 = vmatprep.subr.bf16.mxu1 %v2244_v59  ;;  %v2292_v59 = vld [vmem:[#allocation5 + $0x2c0] ss:$8 sps:$4 sm:$0xff]  }
  0x90   : > { %1060 = vmatpush2.bf16.msra.mxu0 %v2243_v60  ;;  %v2297_v60 = vld [vmem:[#allocation5 + $0x2b4] ss:$8 sps:$4 sm:$0xff]  }
  0x91   : > { %1061 = vmatprep.subr.bf16.mxu0 %v2247_v61  ;;  %1113 = vmatpush2.bf16.msra.mxu1 %v2246_v62  ;;  %v2295_v61 = vld [vmem:[#allocation5 + $0x2b0] ss:$8 sps:$4 sm:$0xff]   ;;  %v2303_v62 = vld [vmem:[#allocation5 + $0x2a4] ss:$8 sps:$4 sm:$0xff]  }
  0x92   : > { %1114 = vmatprep.subr.bf16.mxu1 %v2250_v63  ;;  %v2301_v63 = vld [vmem:[#allocation5 + $0x2a0] ss:$8 sps:$4 sm:$0xff]  }
  0x94   : > { %1062 = vmatpush2.bf16.msra.mxu0 %v2249_v0  ;;  %v2306_v0 = vld [vmem:[#allocation5 + $0x294] ss:$8 sps:$4 sm:$0xff]  }
  0x95   : > { %1063 = vmatprep.subr.bf16.mxu0 %v2253_v2  ;;  %1115 = vmatpush2.bf16.msra.mxu1 %v2252_v1  ;;  %v2304_v1 = vld [vmem:[#allocation5 + $0x290] ss:$8 sps:$4 sm:$0xff]   ;;  %v2309_v2 = vld [vmem:[#allocation5 + $0x284] ss:$8 sps:$4 sm:$0xff]  }
  0x96   : > { %1116 = vmatprep.subr.bf16.mxu1 %v2256_v4  ;;  %v388_v4 = vld [vmem:[%s2698_s20 + $0x20] sm:$0xff] }
  0x98   : > { %1064 = vmatpush2.bf16.msra.mxu0 %v2255_v3  ;;  %v2307_v3 = vld [vmem:[#allocation5 + $0x280] ss:$8 sps:$4 sm:$0xff]  }
  0x99   : > { %1139 = vmatprep.subr.bf16.mxu0 %v2261_v8  ;;  %1117 = vmatpush2.bf16.msra.mxu1 %v2258_v6  ;;  %v403_v6 = vld [vmem:[%s2698_s20 + $0x98] sm:$0xff]  ;;  %v416_v8 = vpack.c.bf16 %v395_v5, %v388_v4 }
  0x9a   : > { %1206 = vmatprep.subr.bf16.mxu1 %v2300_v18  ;;  %v424_v9 = vpack.c.bf16 %v410_v7, %v403_v6  ;;  %v2315_v18 = vld [vmem:[#allocation7 + $0x28] sm:$0xff]  }
  0x9b   : > { %1066 = vmatmul.mubr.bf16.vlgmr.msra.gmra.mxu0 %v412_v11  ;;  %v409_v11 = vld [vmem:[%s2698_s20 + $0xc8] sm:$0xff]  ;;  %s2438_s20 = sshll.u32 %s2514_s14, 4  ;;  %s2439_s20 = int_to_ptr.vmem [resolvable:$false] %s2438_s20 }
  0x9c   : > { %1140 = vmatpush1.bf16.msra.mxu0 %v2259_v12  ;;  %1075 = vmatprep.mubr.bf16.mxu0 %v420_v17  ;;  %v423_v12 = vpack.c.bf16 %v409_v11, %v402_v10  ;;  %v2314_v17 = vld [vmem:[#allocation7 + $0x68] sm:$0xff]   ;;  %s2440_s15 = scalar_lea.vmem %s2439_s20, 512  ;;  %p2441_p6 = scmp.lt.s32.totalorder %s2807_s19, %s2439_s20 }
  0x9d   : > { %1119 = vmatmul.mubr.bf16.vlgmr.msra.gmra.mxu1 %v414_v15  ;;  %1141 = vmatprep.subr.bf16.mxu0 %v2264_v16  ;;  %v2312_v15 = vld [vmem:[#allocation7 + $0x70] sm:$0xff]   ;;  %p2442_p12 = scmp.lt.s32.totalorder %s2440_s15, %s2434_s22 }
  0x9e   : > { %1207 = vmatpush1.bf16.msra.mxu1 %v2298_v19  ;;  %1128 = vmatprep.mubr.bf16.mxu1 %v422_v24  ;;  %v2313_v16 = vld [vmem:[#allocation7 + $0x30] sm:$0xff]   ;;  %v2316_v19 = vld [vmem:[#allocation7 + $0x60] sm:$0xff]  }
  0x9f   : > { %2008 = vmatprep.subr.bf16.mxu1 %v2310_v13  ;;  %v2321_v24 = vld [vmem:[#allocation7 + $0x10] sm:$0xff]   ;;  %p2443_p3 = por %p2442_p12, %p2441_p6 }
  0xa0   : > { %1142 = vmatpush1.bf16.msra.mxu0 %v2262_v22  ;;  %v2319_v22 = vld [vmem:[#allocation7 + $0x18] sm:$0xff]  }
  0xa1   : > { %1143 = vmatprep.subr.bf16.mxu0 %v2267_v23  ;;  %v2320_v23 = vld [vmem:[#allocation7 + $0x50] sm:$0xff]   ;;  %p2444_p9 = pnand %p2443_p3, %p2437_p2 }
  0xa3   : > { %1076 = vmatmul.mubr.bf16.gmra.mxu0 %v419_v29  ;;  %v2741_v29 = vld [vmem:[%s2855_s5 + $0x38] sm:$0xff]  }
  0xa4   : > { %1144 = vmatpush1.bf16.msra.mxu0 %v2265_v30  ;;  %1171 = vmatprep.mubr.bf16.mxu0 %v417_v35 }
  0xa5   : > { %1145 = vmatprep.subr.bf16.mxu0 %v2270_v33  ;;  %1129 = vmatmul.mubr.bf16.gmra.mxu1 %v421_v34 }
  0xa6   : > { %1224 = vmatprep.mubr.bf16.mxu1 %v2513_v41 }
  0xa8   : > { %1146 = vmatpush1.bf16.msra.mxu0 %v2268_v36 }
  0xa9   : > { %1147 = vmatprep.subr.bf16.mxu0 %v2273_v37 }
  0xac   : > { %1148 = vmatpush1.bf16.msra.mxu0 %v2271_v40  ;;  %v526_v40 = vlaneseq }
  0xad   : > { %1149 = vmatprep.subr.bf16.mxu0 %v2276_v42  ;;  %1948 = vmatmul.mubr.msk.bf16.vlgmr.msra.gmra.mxu1 %vm1026_vm0, %v418_v43 }
  0xae   : > { %1234 = vmatprep.mubr.bf16.mxu1 %v2513_v41  ;;  %2009 = vmatpush3.bf16.msra.mxu1 %v2311_v14  ;;  %v527_v43 = vshrl.u32 %v526_v40, 7 }
  0xaf   : > { %2010 = vmatprep.subr.bf16.mxu1 %v2312_v15 }
  0xb0   : > { %1150 = vmatpush1.bf16.msra.mxu0 %v2274_v44  ;;  %v532_v46 = vsub.s32 1, %v527_v43 }
  0xb1   : > { %1151 = vmatprep.subr.bf16.mxu0 %v2279_v45 }
  0xb2   : > { %2011 = vmatpush3.bf16.msra.mxu1 %v2313_v16 }
  0xb3   : > { %2012 = vmatprep.subr.bf16.mxu1 %v2314_v17 }
  0xb4   : > { %1152 = vmatpush1.bf16.msra.mxu0 %v2277_v48  ;;  %v528_v48 = vsub.s32 0, %v527_v43 }
  0xb5   : > { %1153 = vmatprep.subr.bf16.mxu0 %v2282_v49  ;;  %1949 = vmatmul.mubr.msk.bf16.gmra.mxu1 %vm1026_vm0, %v425_v50 }
  0xb6   : > { %2013 = vmatpush3.bf16.msra.mxu1 %v2315_v18 }
  0xb7   : > { %2014 = vmatprep.subr.bf16.mxu1 %v2316_v19 }
  0xb8   : > { %1154 = vmatpush1.bf16.msra.mxu0 %v2280_v51  ;;  %v533_v51 = vrot.slane %v524_v47, %v532_v46 }
  0xb9   : > { %1155 = vmatprep.subr.bf16.mxu0 %v2285_v52  ;;  %v529_v52 = vrot.slane %v524_v47, %v528_v48 }
  0xba   : > { %2015 = vmatpush3.bf16.msra.mxu1 %v2317_v20 }
  0xbb   : > { %2016 = vmatprep.subr.bf16.mxu1 %v2318_v21 }
  0xbc   : > { %1156 = vmatpush2.bf16.msra.mxu0 %v2283_v53 }
  0xbd   : > { %1157 = vmatprep.subr.bf16.mxu0 %v2288_v54 }
  0xbe   : > { %2017 = vmatpush3.bf16.msra.mxu1 %v2319_v22 }
  0xbf   : > { %2018 = vmatprep.subr.bf16.mxu1 %v2320_v23 }
  0xc0   : > { %1158 = vmatpush2.bf16.msra.mxu0 %v2286_v55 }
  0xc1   : > { %1159 = vmatprep.subr.bf16.mxu0 %v2291_v56 }
  0xc2   : > { %2019 = vmatpush3.bf16.msra.mxu1 %v2321_v24 }
  0xc3   : > { %2020 = vmatprep.subr.bf16.mxu1 %v2322_v25 }
  0xc4   : > { %1160 = vmatpush2.bf16.msra.mxu0 %v2289_v57 }
  0xc5   : > { %1161 = vmatprep.subr.bf16.mxu0 %v2294_v58 }
  0xc6   : > { %2021 = vmatpush3.bf16.msra.mxu1 %v2323_v26 }
  0xc7   : > { %2022 = vmatprep.subr.bf16.mxu1 %v2324_v27 }
  0xc8   : > { %1162 = vmatpush2.bf16.msra.mxu0 %v2292_v59 }
  0xc9   : > { %1163 = vmatprep.subr.bf16.mxu0 %v2297_v60 }
  0xca   : > { %2023 = vmatpush3.bf16.msra.mxu1 %v2325_v28 }
  0xcb   : > { %2052 = vmatprep.subr.bf16.mxu1 %v2741_v29 }
  0xcc   : > { %1164 = vmatpush2.bf16.msra.mxu0 %v2295_v61 }
  0xcd   : > { %1165 = vmatprep.subr.bf16.mxu0 %v2303_v62 }
  0xd0   : > { %1166 = vmatpush2.bf16.msra.mxu0 %v2301_v63 }
  0xd1   : > { %1167 = vmatprep.subr.bf16.mxu0 %v2306_v0 }
  0xd4   : > { %1168 = vmatpush2.bf16.msra.mxu0 %v2304_v1 }
  0xd5   : > { %1169 = vmatprep.subr.bf16.mxu0 %v2309_v2 }
  0xd8   : > { %1170 = vmatpush2.bf16.msra.mxu0 %v2307_v3 }
  0xdb   : > { %1172 = vmatmul.mubr.bf16.vlgmr.msra.gmra.mxu0 %v416_v8 }
  0xdc   : > { %1181 = vmatprep.mubr.bf16.mxu0 %v424_v9 }
  0xe3   : > { %1182 = vmatmul.mubr.bf16.gmra.mxu0 %v423_v12 }
 0x15b   : > { %v1067_v34 = vpop.f32.mrf.mxu0 }
 0x15c   : > { %v1068_v56 = vadd.f32 %v1067_v34, %v529_v52 }
 0x15d   : > { %v1120_v30 = vpop.f32.mrf.mxu1  ;;  %v1069_v36 = vpop.f32.mrf.mxu0 }
 0x15e   : > { %v1070_v55 = vadd.f32 %v1069_v36, %v533_v51  ;;  %v1121_v63 = vadd.f32 %v1120_v30, %v1068_v56  ;;  %v2334_v56 = vld [vmem:[%s2857_s7 + $0x18] sm:$0xff]  }
 0x15f   : > { %v1122_v31 = vpop.f32.mrf.mxu1  ;;  %v1071_v38 = vpop.f32.mrf.mxu0  ;;  %2072 = vmatprep.subr.bf16.mxu0 %v2334_v56 }
 0x160   : > { %v1072_v58 = vadd.f32 %v1071_v38, %v529_v52  ;;  %v1123_v61 = vadd.f32 %v1122_v31, %v1070_v55  ;;  %v2333_v55 = vld [vmem:[%s2855_s5] sm:$0xff]   ;;  %2073 = vmatpush3.bf16.msra.mxu0 %v2334_v56 }
 0x161   : > { %v1124_v32 = vpop.f32.mrf.mxu1  ;;  %v1073_v41 = vpop.f32.mrf.mxu0 }
 0x162   : > { %v1074_v62 = vadd.f32 %v1073_v41, %v533_v51  ;;  %v1125_v1 = vadd.f32 %v1124_v32, %v1072_v58 }
 0x163   : > { %v1126_v33 = vpop.f32.mrf.mxu1  ;;  %v1077_v44 = vpop.f32.mrf.mxu0 }
 0x164   : > { %v1127_v6 = vadd.f32 %v1126_v33, %v1074_v62  ;;  %v1078_v9 = vadd.f32 %v1077_v44, %v529_v52 }
 0x165   : > { %v1130_v35 = vpop.f32.mrf.mxu1  ;;  %v1079_v49 = vpop.f32.mrf.mxu0 }
 0x166   : > { %v1080_v7 = vadd.f32 %v1079_v49, %v533_v51  ;;  %v1131_v21 = vadd.f32 %v1130_v35, %v1078_v9 }
 0x167   : > { %v1132_v37 = vpop.f32.mrf.mxu1  ;;  %v1081_v53 = vpop.f32.mrf.mxu0 }
 0x168   : > { %v1082_v11 = vadd.f32 %v1081_v53, %v529_v52  ;;  %v1133_v18 = vadd.f32 %v1132_v37, %v1080_v7  ;;  %v2327_v37 = vld [vmem:[%s2855_s5 + $0x30] sm:$0xff]   ;;  %v2330_v52 = vld [vmem:[%s2855_s5 + $0x18] sm:$0xff]  }
 0x169   : > { %v1134_v39 = vpop.f32.mrf.mxu1  ;;  %v1083_v57 = vpop.f32.mrf.mxu0  ;;  %v2331_v53 = vld [vmem:[%s2855_s5 + $0x10] sm:$0xff]  }
 0x16a   : > { %v1084_v19 = vadd.f32 %v1083_v57, %v533_v51  ;;  %v1135_v24 = vadd.f32 %v1134_v39, %v1082_v11 }
 0x16b   : > { %v1136_v42 = vpop.f32.mrf.mxu1 }
 0x16c   : > { %v1137_v33 = vadd.f32 %v1136_v42, %v1084_v19  ;;  %v2328_v42 = vld [vmem:[%s2855_s5 + $0x28] sm:$0xff]  }
 0x16d   : > { %v1226_v45 = vpop.f32.mrf.mxu1 }
 0x16f   : > { %v1228_v50 = vpop.f32.mrf.mxu1 }
 0x171   : > { %v1230_v54 = vpop.f32.mrf.mxu1 }
 0x173   : > { %v1232_v60 = vpop.f32.mrf.mxu1 }
 0x175   : > { %v1236_v5 = vpop.f32.mrf.mxu1 }
 0x177   : > { %v1238_v16 = vpop.f32.mrf.mxu1 }
 0x179   : > { %v1240_v31 = vpop.f32.mrf.mxu1 }
 0x17b   : > { %v1242_v44 = vpop.f32.mrf.mxu1 }
 0x19b   : > { %v1173_v59 = vpop.f32.mrf.mxu0 }
 0x19c   : > { %v1174_v3 = vadd.f32 %v1173_v59, %v1121_v63 }
 0x19d   : > { %v1175_v0 = vpop.f32.mrf.mxu0 }
 0x19e   : > { %v1176_v2 = vadd.f32 %v1175_v0, %v1123_v61  ;;  %v1227_v15 = vadd.f32 %v1226_v45, %v1174_v3 }
 0x19f   : > { %v1177_v4 = vpop.f32.mrf.mxu0 }
 0x1a0   : > { %v1178_v8 = vadd.f32 %v1177_v4, %v1125_v1  ;;  %v1229_v12 = vadd.f32 %v1228_v50, %v1176_v2  ;;  %v1245_v28 = vmax.f32 %v1227_v15, 0.0 }
 0x1a1   : > { %v1179_v10 = vpop.f32.mrf.mxu0 }
 0x1a2   : > { %v1231_v13 = vadd.f32 %v1230_v54, %v1178_v8  ;;  %v1180_v14 = vadd.f32 %v1179_v10, %v1127_v6  ;;  %v1246_v25 = vmax.f32 %v1229_v12, 0.0  ;;  %v2332_v54 = vld [vmem:[%s2855_s5 + $0x8] sm:$0xff]  }
 0x1a3   : > { %v1183_v17 = vpop.f32.mrf.mxu0 }
 0x1a4   : > { %v1233_v20 = vadd.f32 %v1232_v60, %v1180_v14  ;;  %v1247_v22 = vmax.f32 %v1231_v13, 0.0  ;;  %v1184_v30 = vadd.f32 %v1183_v17, %v1131_v21  ;;  %v1950_v60 = vld [vmem:[%s2854_s4] ss:$0 sm:$0xff]  ;;  %v2336_v17 = vld [vmem:[%s2857_s7 + $0x8] sm:$0xff]  }
 0x1a5   : > { %v1185_v23 = vpop.f32.mrf.mxu0  ;;  %v1967_v21 = vld [vmem:[%s2856_s6] ss:$0 sm:$0xff] }
 0x1a6   : > { %v1248_v26 = vmax.f32 %v1233_v20, 0.0  ;;  %v1186_v27 = vadd.f32 %v1185_v23, %v1133_v18  ;;  %v1253_v38 = vpack.c.bf16 %v1247_v22, %v1245_v28  ;;  %v1237_v39 = vadd.f32 %v1236_v5, %v1184_v30  ;;  %v2337_v18 = vld [vmem:[%s2857_s7] sm:$0xff]  }
 0x1a7   : > { %v1187_v32 = vpop.f32.mrf.mxu0 }
 0x1a8   : > { %v1188_v34 = vadd.f32 %v1187_v32, %v1135_v24  ;;  %v1254_v36 = vpack.c.bf16 %v1248_v26, %v1246_v25  ;;  %v1239_v35 = vadd.f32 %v1238_v16, %v1186_v27  ;;  %v1249_v49 = vmax.f32 %v1237_v39, 0.0  ;;  %v2335_v16 = vld [vmem:[%s2857_s7 + $0x10] sm:$0xff]  }
 0x1a9   : > { %v1189_v40 = vpop.f32.mrf.mxu0  ;;  %2074 = vmatprep.subr.bf16.mxu0 %v2335_v16 }
 0x1aa   : > { %v1241_v41 = vadd.f32 %v1240_v31, %v1188_v34  ;;  %v1190_v43 = vadd.f32 %v1189_v40, %v1137_v33  ;;  %1424 = vmatprep.mubr.bf16.mxu1 %v1254_v36  ;;  %v1250_v47 = vmax.f32 %v1239_v35, 0.0  ;;  %2075 = vmatpush3.bf16.msra.mxu0 %v2335_v16  ;;  %v1976_v36 = vld [vmem:[%s2858_s8] ss:$0 sm:$0xff] }
 0x1ab   : > { %1425 = vmatmul.mubr.bf16.vlgmr.msra.gmra.mxu1 %v1253_v38  ;;  %2076 = vmatprep.subr.bf16.mxu0 %v2336_v17 }
 0x1ac   : > { %v1243_v45 = vadd.f32 %v1242_v44, %v1190_v43  ;;  %2053 = vmatpush3.bf16.msra.mxu1 %v2741_v29  ;;  %v1251_v46 = vmax.f32 %v1241_v41, 0.0  ;;  %v2329_v29 = vld [vmem:[%s2855_s5 + $0x20] sm:$0xff]  }
 0x1ad   : > { %2054 = vmatprep.subr.bf16.mxu1 %v2327_v37 }
 0x1ae   : > { %v1252_v48 = vmax.f32 %v1243_v45, 0.0  ;;  %v1255_v51 = vpack.c.bf16 %v1251_v46, %v1249_v49  ;;  %2077 = vmatpush3.bf16.msra.mxu0 %v2336_v17 }
 0x1af   : > { %2078 = vmatprep.subr.bf16.mxu0 %v2337_v18 }
 0x1b0   : > { %v1256_v50 = vpack.c.bf16 %v1252_v48, %v1250_v47  ;;  %2055 = vmatpush3.bf16.msra.mxu1 %v2327_v37 }
 0x1b1   : > { %2056 = vmatprep.subr.bf16.mxu1 %v2328_v42 }
 0x1b2   : > { %1432 = vmatprep.mubr.bf16.mxu1 %v1256_v50  ;;  %2079 = vmatpush3.bf16.msra.mxu0 %v2337_v18 }
 0x1b3   : > { %1433 = vmatmul.mubr.bf16.gmra.mxu1 %v1255_v51 }
 0x1b4   : > { %2057 = vmatpush3.bf16.msra.mxu1 %v2328_v42 }
 0x1b5   : > { %2058 = vmatprep.subr.bf16.mxu1 %v2329_v29 }
 0x1b8   : > { %2059 = vmatpush3.bf16.msra.mxu1 %v2329_v29 }
 0x1b9   : > { %2060 = vmatprep.subr.bf16.mxu1 %v2330_v52 }
 0x1bc   : > { %2061 = vmatpush3.bf16.msra.mxu1 %v2330_v52 }
 0x1bd   : > { %2062 = vmatprep.subr.bf16.mxu1 %v2331_v53 }
 0x1c0   : > { %2063 = vmatpush3.bf16.msra.mxu1 %v2331_v53 }
 0x1c1   : > { %2064 = vmatprep.subr.bf16.mxu1 %v2332_v54 }
 0x1c4   : > { %2065 = vmatpush3.bf16.msra.mxu1 %v2332_v54 }
 0x1c5   : > { %2066 = vmatprep.subr.bf16.mxu1 %v2333_v55 }
 0x1c8   : > { %2067 = vmatpush3.bf16.msra.mxu1 %v2333_v55 }
 0x26b   : > { %v2024_v57 = vpop.f32.mrf.mxu1 }
 0x26d   : > { %v2025_v58 = vpop.f32.mrf.mxu1 }
 0x26e   : > { %v2026_v59 = vadd.f32 %v2025_v58, %v2024_v57 }
 0x26f   : > { %v2027_v61 = vpop.f32.mrf.mxu1 }
 0x270   : > { %v1427_v63 = vadd.f32 %v2026_v59, %v1950_v60 }
 0x271   : > { %v2028_v62 = vpop.f32.mrf.mxu1 }
 0x272   : > { %v2029_v0 = vadd.f32 %v2028_v62, %v2027_v61  ;;  %v1441_v4 = vmax.f32 %v1427_v63, 0.0 }
 0x273   : > { %v2030_v1 = vpop.f32.mrf.mxu1 }
 0x274   : > { %v1430_v2 = vadd.f32 %v2029_v0, %v1950_v60 }
 0x275   : > { %v2031_v3 = vpop.f32.mrf.mxu1 }
 0x276   : > { %v1442_v5 = vmax.f32 %v1430_v2, 0.0  ;;  %v2032_v6 = vadd.f32 %v2031_v3, %v2030_v1 }
 0x277   : > { %v2033_v7 = vpop.f32.mrf.mxu1 }
 0x278   : > { %v1445_v8 = vpack.c.bf16 %v1442_v5, %v1441_v4  ;;  %v1435_v10 = vadd.f32 %v2032_v6, %v1950_v60 }
 0x279   : > { %v2034_v9 = vpop.f32.mrf.mxu1 }
 0x27a   : > { %v2035_v11 = vadd.f32 %v2034_v9, %v2033_v7  ;;  %2068 = vmatprep.mubr.bf16.mxu1 %v1445_v8  ;;  %v1443_v13 = vmax.f32 %v1435_v10, 0.0 }
 0x27c   : > { %v1438_v12 = vadd.f32 %v2035_v11, %v1950_v60 }
 0x27e   : > { %v1444_v14 = vmax.f32 %v1438_v12, 0.0 }
 0x280   : > { %v1446_v15 = vpack.c.bf16 %v1444_v14, %v1443_v13 }
 0x282   : > { %2069 = vmatmul.mubr.bf16.vlgmr.msra.gmra.mxu1 %v1446_v15 }
 0x342   : > { %v2070_v19 = vpop.f32.mrf.mxu1 }
 0x343   : > { %v1561_v25 = vadd.f32 %v2070_v19, %v1967_v21 }
 0x344   : > { %v1552_v20 = vpop.f32.mrf.mxu1 }
 0x345   : > { %v1553_v23 = vadd.f32 %v1967_v21, %v1552_v20  ;;  %v1569_v32 = vmax.f32 %v1561_v25, 0.0 }
 0x346   : > { %v2071_v22 = vpop.f32.mrf.mxu1 }
 0x347   : > { %v1564_v24 = vadd.f32 %v2071_v22, %v1967_v21  ;;  %v1567_v30 = vmax.f32 %v1553_v23, 0.0 }
 0x348   : > { %v1555_v26 = vpop.f32.mrf.mxu1 }
 0x349   : > { %v1556_v27 = vadd.f32 %v1967_v21, %v1555_v26  ;;  %v1570_v28 = vmax.f32 %v1564_v24, 0.0 }
 0x34b   : > { %v1568_v31 = vmax.f32 %v1556_v27, 0.0  ;;  %v1572_v34 = vpack.c.bf16 %v1570_v28, %v1569_v32 }
 0x34d   : > { %v1571_v33 = vpack.c.bf16 %v1568_v31, %v1567_v30 }
 0x34f   : > { %2080 = vmatprep.mubr.msk.bf16.mxu0 %vm1612_vm1, %v1571_v33 }
 0x350   : > { %2081 = vmatmul.mubr.msk.bf16.vlgmr.msra.gmra.mxu0 %vm1612_vm1, %v1572_v34 }
 0x410   : > { %v2082_v38 = vpop.f32.mrf.mxu0 }
 0x411   : > { %v2790_v40 = vadd.f32 %v2082_v38, %v1976_v36 }
 0x412   : > { %v1653_v37 = vpop.f32.mrf.mxu0 }
 0x413   : > { %v1654_v35 = vadd.f32 %v1976_v36, %v1653_v37  ;;  %1672 = vmax.xlane.f32.xlu1 %v2790_v40 }
 0x414   : > { %v2083_v41 = vpop.f32.mrf.mxu0 }
 0x415   : > { %v2793_v43 = vadd.f32 %v2083_v41, %v1976_v36  ;;  %1668 = vmax.xlane.f32.xlu0 %v1654_v35 }
 0x416   : > { %v1656_v39 = vpop.f32.mrf.mxu0 }
 0x417   : > { %v1657_v44 = vadd.f32 %v1976_v36, %v1656_v39  ;;  %1674 = vmax.xlane.f32.xlu1 %v2793_v43 }
 0x419   : > { %1670 = vmax.xlane.f32.xlu0 %v1657_v44 }
 0x49c   : > { %v1673_v45 = vpop.xlane.xlu1 %1672 }
 0x49d   : > { %v1678_v46 = vsub.f32 %v2790_v40, %v1673_v45 }
 0x49e   : > { %v1669_v42 = vpop.xlane.xlu0 %1668 }
 0x49f   : > { %v1676_v47 = vsub.f32 %v1654_v35, %v1669_v42  ;;  %v1684_v50 = vmul.f32 1.442695, %v1678_v46 }
 0x4a0   : > { %v1675_v48 = vpop.xlane.xlu1 %1674 }
 0x4a1   : > { %v1680_v49 = vmul.f32 1.442695, %v1676_v47  ;;  %v1679_v29 = vsub.f32 %v2793_v43, %v1675_v48 }
 0x4a2   : > { %v1671_v51 = vpop.xlane.xlu0 %1670 }
 0x4a3   : > { %2338 = vpow2.f32 %v1680_v49  ;;  %v1677_v52 = vsub.f32 %v1657_v44, %v1671_v51  ;;  %v1686_v54 = vmul.f32 1.442695, %v1679_v29 }
 0x4a4   : > { %2340 = vpow2.f32 %v1684_v50 }
 0x4a5   : > { %v1682_v53 = vmul.f32 1.442695, %v1677_v52 }
 0x4a7   : > { %2342 = vpow2.f32 %v1682_v53 }
 0x4a8   : > { %2344 = vpow2.f32 %v1686_v54 }
 0x4b0   : > { %v2339_v55 = vpop.eup %2338 }
 0x4b1   : > { %1688 = vadd.xlane.f32.xlu0 %v2339_v55  ;;  %v2341_v56 = vpop.eup %2340 }
 0x4b4   : > { %v2343_v57 = vpop.eup %2342 }
 0x4b5   : > { %1692 = vadd.xlane.f32.xlu0 %v2341_v56  ;;  %1690 = vadd.xlane.f32.xlu1 %v2343_v57  ;;  %v2345_v58 = vpop.eup %2344 }
 0x4b9   : > { %1694 = vadd.xlane.f32.xlu1 %v2345_v58 }
 0x53a   : > { %v1689_v59 = vpop.xlane.xlu0 %1688 }
 0x53b   : > { %2346 = vlog2.f32 %v1689_v59 }
 0x53e   : > { %v1691_v60 = vpop.xlane.xlu1 %1690  ;;  %v1693_v61 = vpop.xlane.xlu0 %1692 }
 0x53f   : > { %2348 = vlog2.f32 %v1691_v60 }
 0x540   : > { %2350 = vlog2.f32 %v1693_v61 }
 0x542   : > { %v1695_v62 = vpop.xlane.xlu1 %1694 }
 0x543   : > { %2352 = vlog2.f32 %v1695_v62 }
 0x548   : > { %v2347_v63 = vpop.eup %2346 }
 0x549   : > { %v1697_v0 = vmul.f32 0.6931472, %v2347_v63 }
 0x54b   : > { %v1704_v3 = vadd.f32 %v1697_v0, %v1669_v42 }
 0x54c   : > { %v2349_v1 = vpop.eup %2348 }
 0x54d   : > { %v2351_v2 = vpop.eup %2350  ;;  %v1699_v4 = vmul.f32 0.6931472, %v2349_v1  ;;  %v1708_v8 = vsub.f32 %v1654_v35, %v1704_v3 }
 0x54e   : > { %v1701_v5 = vmul.f32 0.6931472, %v2351_v2 }
 0x54f   : > { %v1705_v6 = vadd.f32 %v1699_v4, %v1671_v51 }
 0x550   : > { %v2353_v7 = vpop.eup %2352  ;;  %v1706_v10 = vadd.f32 %v1701_v5, %v1673_v45 }
 0x551   : > { %v1709_v9 = vsub.f32 %v1657_v44, %v1705_v6  ;;  %v1703_v11 = vmul.f32 0.6931472, %v2353_v7 }
 0x552   : > { %v1710_v14 = vsub.f32 %v2790_v40, %v1706_v10 }
 0x553   : > { %v2000_v12 = vpack.c.bf16 %v1709_v9, %v1708_v8  ;;  %v1707_v13 = vadd.f32 %v1703_v11, %v1675_v48 }
 0x555   : > { %2001 = vst [vmem:[%s380_s27] sm:$0xff] %v2000_v12   ;;  %v1711_v15 = vsub.f32 %v2793_v43, %v1707_v13 }
 0x557   : > { %v2005_v16 = vpack.c.bf16 %v1711_v15, %v1710_v14 }
 0x559   : > { %2007 = vst [vmem:[%s380_s27 + $0x8] sm:$0xff] %v2005_v16  }
 0x55a   : > { %2447 = shalt.err (!%p2444_p9)
}
 0x55b   : > { %s2448_s17 = scalar_lea.hbm %s2805_s25, 256  ;;  %s2452_s23 = scalar_lea.hbm %s2859_s9, 512 }
 0x55c   : > { %p2449_p13 = scmp.ne.s32.totalorder %s2805_s25, %s2448_s17  ;;  %p2453_p4 = scmp.lt.s32.totalorder %s2805_s25, %s2859_s9 }
 0x55d   : > { %p2454_p8 = scmp.lt.s32.totalorder %s2452_s23, %s2448_s17 }
 0x55e   : > { %p2450_p5 = pnand %p2449_p13, %p2880_p10 }
 0x55f   : > { %p2455_p7 = por %p2454_p8, %p2453_p4 }
 0x560   : > { %p2451_p0 = pneg %p2450_p5 }
 0x562   : > { %p2456_p11 = pnand %p2455_p7, %p2451_p0 }
 0x564   : > { %2459 = shalt.err (!%p2456_p11)
}
 0x565   : > { %s2515_s3 = smov 64   ;;  %s2516_s1 = smov 4  }
 0x566   : > { %2097 = dma.vmem_to_hbm [thread:$0]  (%p2880_p10), %s2807_s19, 256, %s2805_s25, %s1733_s13, %s2515_s3, %s2515_s3, %s2516_s1  }
 0x567 PF: > { %s1761_s22 = sand.u32 1, %s2490_s30   ;;  %p2881_p1 = scmp.ne.s32.totalorder %s2867_s16, 0 }
 0x568   : > { %p2882_p2 = scmp.ge.s32.totalorder %s2502_s12, 2  ;;  %s1762_s14 = scalar_lea.sflag [#allocation4], %s1761_s22 }
 0x56a   : > { %p2111_p6 = pnand %p2882_p2, %p2881_p1 }
 0x56c   : > { %p2112_p12 = pneg %p2111_p6 }
 0x56e   : > { %2485 = dma.done.wait (%p2112_p12), %s1762_s14, 256  }
 0x56f   : > { %2487 = vsyncadd (%p2112_p12), %s1762_s14, 4294967040  ;;  %s2883_s20 = sld [smem:[#allocation12_spill]]  ;;  %p23_p3 = scmp.ge.s32.totalorder %s2639_s21, 4  }
 0x570   : > { %s2884_s30 = smov %s2494_s10  ;;  %s2885_s10 = smov %s2498_s11 }
 0x571   : > { %s2887_s12 = smov %s2639_s21  ;;  %25 = sbr.rel (!%p23_p3) target bundleno = 9 (0x9), region = 109 }
 0x575   : > { %s2886_s11 = smov %s2883_s20 }
 0x576   :  { %1767 = vsyncpa [#allocation3], 1 }
 0x577   :  { %1769 = vsyncpa [#allocation3 + $0x1], 1 }
 0x578   :  { %1770 = vsyncpa [#allocation6], 1 }
 0x579   :  { %1771 = vsyncpa [#allocation4], 1 }
 0x57a   :  { %1773 = vsyncpa [#allocation4 + $0x1], 1 }

</bundles_post_ra>
